<compile_context>
chip_gen: v7x
topology: tpu7x:2x2x1
jax: 0.10.0
libtpu: 0.0.40
codegen_flags: <defaults>
</compile_context>

<pallas_src>
import functools

import jax
import jax.numpy as jnp
from jax import lax
from jax.experimental import pallas as pl
from jax.experimental.pallas import tpu as pltpu

_LANE = 128
_SMOOTH = 1.0

# Per-pipeline-step VMEM budget used to size the row tile: 2 inputs x 2
# pipeline buffers of the native dtype plus ~4 block-sized f32 temporaries
# (casts / product / sum) must fit with headroom under the scoped limit below.
_STEP_VMEM_BUDGET = 32 * 1024 * 1024
_VMEM_LIMIT_BYTES = 48 * 1024 * 1024


def _dice_partial_kernel(x_ref, t_ref, inter_ref, sum_ref, *,
                         rows, tile_r, tiles_per_slice):
    """Accumulate lane-dense per-sample partials for one reduction slice.

    x_ref / t_ref     : (N, tile_r, 128) blocks of the flattened inputs.
    inter_ref/sum_ref : (1, N, 128) lane-resident partials, resident across k.
    """
    c = pl.program_id(0)          # reduction slice   ("parallel")
    k = pl.program_id(1)          # row tile in slice ("arbitrary")

    @pl.when(k == 0)
    def _init():
        inter_ref[...] = jnp.zeros_like(inter_ref)
        sum_ref[...] = jnp.zeros_like(sum_ref)

    # Rows still valid from this tile's (unclamped) start offset.
    start = (c * tiles_per_slice + k) * tile_r
    valid = rows - start

    def _accumulate(x, t):
        # Row/sublane-axis reduce only -> (N, 128); pure VPU vreg adds.
        inter_ref[...] += jnp.sum(x * t, axis=1)[None, :, :]
        sum_ref[...] += jnp.sum(x + t, axis=1)[None, :, :]

    @pl.when(valid >= tile_r)
    def _full_tile():
        _accumulate(x_ref[...].astype(jnp.float32),
                    t_ref[...].astype(jnp.float32))

    @pl.when(valid < tile_r)
    def _ragged_tile():
        # Ragged last tile of a slice, or a clamped out-of-range tail tile
        # (valid <= 0 -> fully zeroed).  Only this rare path pays for the mask.
        x = x_ref[...].astype(jnp.float32)
        t = t_ref[...].astype(jnp.float32)
        row_idx = lax.broadcasted_iota(jnp.int32, x.shape, dimension=1)
        keep = row_idx < valid
        _accumulate(jnp.where(keep, x, 0.0), jnp.where(keep, t, 0.0))


def dice_loss(inp, target):
    """Pallas implementation of DiceLoss.forward (returns a scalar)."""
    assert inp.shape == target.shape
    n = inp.shape[0]

    x = inp.reshape(n, -1)            # native dtype; f32 cast happens in-kernel
    t = target.reshape(n, -1)
    d = x.shape[1]

    # View the feature dim as (rows, 128).  Typical conv feature maps (and the
    # demo) are already 128-divisible, so no pad pass happens.
    # TODO(synk): for d % 128 != 0 this pad is a full extra HBM read+write
    # pass; an in-kernel trailing-lane mask would avoid it.
    rem = d % _LANE
    if rem:
        pad = _LANE - rem
        x = jnp.pad(x, ((0, 0), (0, pad)))
        t = jnp.pad(t, ((0, 0), (0, pad)))
        d += pad
    rows = d // _LANE
    x3 = x.reshape(n, rows, _LANE)
    t3 = t.reshape(n, rows, _LANE)

    # Row-tile size: aligned to the dtype's sublane packing factor and sized so
    # native windows + f32 temporaries stay inside the per-step VMEM budget
    # (~4 MiB native blocks per input for f32).
    itemsize = jnp.dtype(x3.dtype).itemsize
    pack = max(8, 32 // itemsize)                 # 8 f32, 16 bf16, 32 int8/fp8
    bytes_per_row_step = n * _LANE * (4 * itemsize + 16)
    max_rows = max(pack, (_STEP_VMEM_BUDGET // bytes_per_row_step) // pack * pack)
    tile_r = rows if rows <= max_rows else max_rows

    num_blocks = pl.cdiv(rows, tile_r)
    # 2-way split feeds both v7x TensorCores; when num_blocks is odd one slice
    # runs a single cheap fully-masked tail step.  On 1-TC chips the extra
    # slice is just one more tiny resident output block.
    n_slices = 2 if num_blocks >= 2 else 1
    tiles_per_slice = pl.cdiv(num_blocks, n_slices)

    def in_map(c, k):
        # Clamp so trailing (fully masked) tiles of the last slice stay in
        # bounds; their contribution is zeroed by the gated in-kernel mask.
        return (0, jnp.minimum(c * tiles_per_slice + k, num_blocks - 1), 0)

    def out_map(c, k):
        return (c, 0, 0)

    kernel = functools.partial(
        _dice_partial_kernel,
        rows=rows, tile_r=tile_r, tiles_per_slice=tiles_per_slice)

    inter_part, sum_part = pl.pallas_call(
        kernel,
        out_shape=(
            jax.ShapeDtypeStruct((n_slices, n, _LANE), jnp.float32),
            jax.ShapeDtypeStruct((n_slices, n, _LANE), jnp.float32),
        ),
        grid_spec=pltpu.PrefetchScalarGridSpec(
            num_scalar_prefetch=0,
            grid=(n_slices, tiles_per_slice),
            in_specs=[
                pl.BlockSpec((n, tile_r, _LANE), in_map),
                pl.BlockSpec((n, tile_r, _LANE), in_map),
            ],
            out_specs=[
                pl.BlockSpec((1, n, _LANE), out_map),
                pl.BlockSpec((1, n, _LANE), out_map),
            ],
        ),
        compiler_params=pltpu.CompilerParams(
            dimension_semantics=("parallel", "arbitrary"),
            vmem_limit_bytes=_VMEM_LIMIT_BYTES,
        ),
    )(x3, t3)

    # Tiny combine in plain JAX: slice + lane reduce, then the dice formula.
    inter = jnp.sum(inter_part, axis=(0, 2))       # (n,) per-sample intersection
    sums = jnp.sum(sum_part, axis=(0, 2))          # (n,) sum(x) + sum(t)
    dice = 2.0 * (inter + _SMOOTH) / (sums + _SMOOTH)
    return 1.0 - jnp.sum(dice) / n


def dice_loss_ref(inp, target):
    """Pure-JAX reference mirroring the PyTorch module."""
    n = target.shape[0]
    smooth = 1.0
    xf = inp.reshape(n, -1).astype(jnp.float32)
    tf = target.reshape(n, -1).astype(jnp.float32)
    inter = (xf * tf).sum(axis=1)
    loss = 2.0 * (inter + smooth) / (xf.sum(axis=1) + tf.sum(axis=1) + smooth)
    return 1.0 - loss.sum() / n


if __name__ == "__main__":
    key = jax.random.PRNGKey(0)
    k1, k2 = jax.random.split(key)

    # NCHW, small shapes: batch=2, channels=4, spatial=16x16
    x = jax.nn.sigmoid(jax.random.normal(k1, (2, 4, 16, 16), dtype=jnp.float32))
    t = (jax.random.uniform(k2, (2, 4, 16, 16)) > 0.5).astype(jnp.float32)

    loss = jax.jit(dice_loss)(x, t)
    loss = jax.block_until_ready(loss)

    ref = dice_loss_ref(x, t)
    assert jnp.allclose(loss, ref, rtol=1e-5, atol=1e-5), (loss, ref)

    print("KERNEL_OK")
</pallas_src>

<mosaic_0001>
module attributes {stable_mosaic.version = 11 : i64} {
  func.func @_dice_partial_kernel(%arg0: i32, %arg1: i32, %arg2: memref<2x8x128xf32, #tpu.memory_space<vmem>>, %arg3: memref<2x8x128xf32, #tpu.memory_space<vmem>>, %arg4: memref<1x2x128xf32, #tpu.memory_space<vmem>>, %arg5: memref<1x2x128xf32, #tpu.memory_space<vmem>>) attributes {dimension_semantics = [#tpu.dimension_semantics<parallel>, #tpu.dimension_semantics<arbitrary>], iteration_bounds = array<i64: 1, 1>, scalar_prefetch = 0 : i64, scratch_operands = 0 : i64, tpu.core_type = #tpu.core_type<tc>, window_params = [{transform_indices = @transform_0, window_bounds = array<i64: 2, 8, 128>}, {transform_indices = @transform_1, window_bounds = array<i64: 2, 8, 128>}, {transform_indices = @transform_2, window_bounds = array<i64: 1, 2, 128>}, {transform_indices = @transform_3, window_bounds = array<i64: 1, 2, 128>}]} {
    %c0_i32 = arith.constant 0 : i32
    %0 = arith.cmpi eq, %arg1, %c0_i32 : i32
    %1 = arith.extui %0 : i1 to i32
    %c0_i32_0 = arith.constant 0 : i32
    %2 = arith.cmpi ne, %1, %c0_i32_0 : i32
    scf.if %2 {
      %cst = arith.constant 0.000000e+00 : f32
      %13 = vector.broadcast %cst : f32 to vector<1x2x128xf32>
      %c0 = arith.constant 0 : index
      %c0_6 = arith.constant 0 : index
      %c0_7 = arith.constant 0 : index
      %14 = vector.load %arg4[%c0, %c0_6, %c0_7] : memref<1x2x128xf32, #tpu.memory_space<vmem>>, vector<1x2x128xf32>
      tpu.vector_store %arg4[%c0, %c0_6, %c0_7], %13 {strides = array<i32>} : memref<1x2x128xf32, #tpu.memory_space<vmem>>, vector<1x2x128xf32>,
      %cst_8 = arith.constant 0.000000e+00 : f32
      %15 = vector.broadcast %cst_8 : f32 to vector<1x2x128xf32>
      %c0_9 = arith.constant 0 : index
      %c0_10 = arith.constant 0 : index
      %c0_11 = arith.constant 0 : index
      %16 = vector.load %arg5[%c0_9, %c0_10, %c0_11] : memref<1x2x128xf32, #tpu.memory_space<vmem>>, vector<1x2x128xf32>
      tpu.vector_store %arg5[%c0_9, %c0_10, %c0_11], %15 {strides = array<i32>} : memref<1x2x128xf32, #tpu.memory_space<vmem>>, vector<1x2x128xf32>,
    } else {
    }
    %c1_i32 = arith.constant 1 : i32
    %3 = arith.muli %arg0, %c1_i32 : i32
    %4 = arith.addi %3, %arg1 : i32
    %c8_i32 = arith.constant 8 : i32
    %5 = arith.muli %4, %c8_i32 : i32
    %c8_i32_1 = arith.constant 8 : i32
    %6 = arith.subi %c8_i32_1, %5 : i32
    %c8_i32_2 = arith.constant 8 : i32
    %7 = arith.cmpi sge, %6, %c8_i32_2 : i32
    %8 = arith.extui %7 : i1 to i32
    %c0_i32_3 = arith.constant 0 : i32
    %9 = arith.cmpi ne, %8, %c0_i32_3 : i32
    scf.if %9 {
      %c0 = arith.constant 0 : index
      %c0_6 = arith.constant 0 : index
      %c0_7 = arith.constant 0 : index
      %13 = vector.load %arg2[%c0, %c0_6, %c0_7] : memref<2x8x128xf32, #tpu.memory_space<vmem>>, vector<2x8x128xf32>
      %c0_8 = arith.constant 0 : index
      %c0_9 = arith.constant 0 : index
      %c0_10 = arith.constant 0 : index
      %14 = vector.load %arg3[%c0_8, %c0_9, %c0_10] : memref<2x8x128xf32, #tpu.memory_space<vmem>>, vector<2x8x128xf32>
      %c0_11 = arith.constant 0 : index
      %c0_12 = arith.constant 0 : index
      %c0_13 = arith.constant 0 : index
      %15 = vector.load %arg4[%c0_11, %c0_12, %c0_13] : memref<1x2x128xf32, #tpu.memory_space<vmem>>, vector<1x2x128xf32>
      %16 = arith.mulf %13, %14 : vector<2x8x128xf32>
      %cst = arith.constant dense<0.000000e+00> : vector<2x128xf32>
      %17 = vector.multi_reduction <add>, %16, %cst [1] : vector<2x8x128xf32> to vector<2x128xf32>
      %18 = vector.shape_cast %17 : vector<2x128xf32> to vector<1x2x128xf32>
      %19 = arith.addf %15, %18 : vector<1x2x128xf32>
      %c0_14 = arith.constant 0 : index
      %c0_15 = arith.constant 0 : index
      %c0_16 = arith.constant 0 : index
      %20 = vector.load %arg4[%c0_14, %c0_15, %c0_16] : memref<1x2x128xf32, #tpu.memory_space<vmem>>, vector<1x2x128xf32>
      tpu.vector_store %arg4[%c0_14, %c0_15, %c0_16], %19 {strides = array<i32>} : memref<1x2x128xf32, #tpu.memory_space<vmem>>, vector<1x2x128xf32>,
      %c0_17 = arith.constant 0 : index
      %c0_18 = arith.constant 0 : index
      %c0_19 = arith.constant 0 : index
      %21 = vector.load %arg5[%c0_17, %c0_18, %c0_19] : memref<1x2x128xf32, #tpu.memory_space<vmem>>, vector<1x2x128xf32>
      %22 = arith.addf %13, %14 : vector<2x8x128xf32>
      %cst_20 = arith.constant dense<0.000000e+00> : vector<2x128xf32>
      %23 = vector.multi_reduction <add>, %22, %cst_20 [1] : vector<2x8x128xf32> to vector<2x128xf32>
      %24 = vector.shape_cast %23 : vector<2x128xf32> to vector<1x2x128xf32>
      %25 = arith.addf %21, %24 : vector<1x2x128xf32>
      %c0_21 = arith.constant 0 : index
      %c0_22 = arith.constant 0 : index
      %c0_23 = arith.constant 0 : index
      %26 = vector.load %arg5[%c0_21, %c0_22, %c0_23] : memref<1x2x128xf32, #tpu.memory_space<vmem>>, vector<1x2x128xf32>
      tpu.vector_store %arg5[%c0_21, %c0_22, %c0_23], %25 {strides = array<i32>} : memref<1x2x128xf32, #tpu.memory_space<vmem>>, vector<1x2x128xf32>,
    } else {
    }
    %c8_i32_4 = arith.constant 8 : i32
    %10 = arith.cmpi slt, %6, %c8_i32_4 : i32
    %11 = arith.extui %10 : i1 to i32
    %c0_i32_5 = arith.constant 0 : i32
    %12 = arith.cmpi ne, %11, %c0_i32_5 : i32
    scf.if %12 {
      %c0 = arith.constant 0 : index
      %c0_6 = arith.constant 0 : index
      %c0_7 = arith.constant 0 : index
      %13 = vector.load %arg2[%c0, %c0_6, %c0_7] : memref<2x8x128xf32, #tpu.memory_space<vmem>>, vector<2x8x128xf32>
      %c0_8 = arith.constant 0 : index
      %c0_9 = arith.constant 0 : index
      %c0_10 = arith.constant 0 : index
      %14 = vector.load %arg3[%c0_8, %c0_9, %c0_10] : memref<2x8x128xf32, #tpu.memory_space<vmem>>, vector<2x8x128xf32>
      %15 = tpu.iota {dimensions = array<i32: 1>} : vector<2x8x128xi32>
      %16 = vector.broadcast %6 : i32 to vector<2x8x128xi32>
      %17 = arith.cmpi slt, %15, %16 : vector<2x8x128xi32>
      %cst = arith.constant 0.000000e+00 : f32
      %18 = vector.broadcast %cst : f32 to vector<2x8x128xf32>
      %19 = arith.select %17, %13, %18 : vector<2x8x128xi1>, vector<2x8x128xf32>
      %cst_11 = arith.constant 0.000000e+00 : f32
      %20 = vector.broadcast %cst_11 : f32 to vector<2x8x128xf32>
      %21 = arith.select %17, %14, %20 : vector<2x8x128xi1>, vector<2x8x128xf32>
      %c0_12 = arith.constant 0 : index
      %c0_13 = arith.constant 0 : index
      %c0_14 = arith.constant 0 : index
      %22 = vector.load %arg4[%c0_12, %c0_13, %c0_14] : memref<1x2x128xf32, #tpu.memory_space<vmem>>, vector<1x2x128xf32>
      %23 = arith.mulf %19, %21 : vector<2x8x128xf32>
      %cst_15 = arith.constant dense<0.000000e+00> : vector<2x128xf32>
      %24 = vector.multi_reduction <add>, %23, %cst_15 [1] : vector<2x8x128xf32> to vector<2x128xf32>
      %25 = vector.shape_cast %24 : vector<2x128xf32> to vector<1x2x128xf32>
      %26 = arith.addf %22, %25 : vector<1x2x128xf32>
      %c0_16 = arith.constant 0 : index
      %c0_17 = arith.constant 0 : index
      %c0_18 = arith.constant 0 : index
      %27 = vector.load %arg4[%c0_16, %c0_17, %c0_18] : memref<1x2x128xf32, #tpu.memory_space<vmem>>, vector<1x2x128xf32>
      tpu.vector_store %arg4[%c0_16, %c0_17, %c0_18], %26 {strides = array<i32>} : memref<1x2x128xf32, #tpu.memory_space<vmem>>, vector<1x2x128xf32>,
      %c0_19 = arith.constant 0 : index
      %c0_20 = arith.constant 0 : index
      %c0_21 = arith.constant 0 : index
      %28 = vector.load %arg5[%c0_19, %c0_20, %c0_21] : memref<1x2x128xf32, #tpu.memory_space<vmem>>, vector<1x2x128xf32>
      %29 = arith.addf %19, %21 : vector<2x8x128xf32>
      %cst_22 = arith.constant dense<0.000000e+00> : vector<2x128xf32>
      %30 = vector.multi_reduction <add>, %29, %cst_22 [1] : vector<2x8x128xf32> to vector<2x128xf32>
      %31 = vector.shape_cast %30 : vector<2x128xf32> to vector<1x2x128xf32>
      %32 = arith.addf %28, %31 : vector<1x2x128xf32>
      %c0_23 = arith.constant 0 : index
      %c0_24 = arith.constant 0 : index
      %c0_25 = arith.constant 0 : index
      %33 = vector.load %arg5[%c0_23, %c0_24, %c0_25] : memref<1x2x128xf32, #tpu.memory_space<vmem>>, vector<1x2x128xf32>
      tpu.vector_store %arg5[%c0_23, %c0_24, %c0_25], %32 {strides = array<i32>} : memref<1x2x128xf32, #tpu.memory_space<vmem>>, vector<1x2x128xf32>,
    } else {
    }
    return
  }
  func.func @transform_0(%arg0: i32, %arg1: i32) -> (i32, i32, i32) {
    %c1_i32 = arith.constant 1 : i32
    %0 = arith.muli %arg0, %c1_i32 : i32
    %1 = arith.addi %0, %arg1 : i32
    %c0_i32 = arith.constant 0 : i32
    %2 = arith.minsi %1, %c0_i32 : i32
    %c0_i32_0 = arith.constant 0 : i32
    %c0_i32_1 = arith.constant 0 : i32
    %c0_i32_2 = arith.constant 0 : i32
    return %c0_i32_0, %2, %c0_i32_1 : i32, i32, i32
  }
  func.func @transform_1(%arg0: i32, %arg1: i32) -> (i32, i32, i32) {
    %c1_i32 = arith.constant 1 : i32
    %0 = arith.muli %arg0, %c1_i32 : i32
    %1 = arith.addi %0, %arg1 : i32
    %c0_i32 = arith.constant 0 : i32
    %2 = arith.minsi %1, %c0_i32 : i32
    %c0_i32_0 = arith.constant 0 : i32
    %c0_i32_1 = arith.constant 0 : i32
    %c0_i32_2 = arith.constant 0 : i32
    return %c0_i32_0, %2, %c0_i32_1 : i32, i32, i32
  }
  func.func @transform_2(%arg0: i32, %arg1: i32) -> (i32, i32, i32) {
    %c0_i32 = arith.constant 0 : i32
    %c0_i32_0 = arith.constant 0 : i32
    %c0_i32_1 = arith.constant 0 : i32
    return %arg0, %c0_i32, %c0_i32_0 : i32, i32, i32
  }
  func.func @transform_3(%arg0: i32, %arg1: i32) -> (i32, i32, i32) {
    %c0_i32 = arith.constant 0 : i32
    %c0_i32_0 = arith.constant 0 : i32
    %c0_i32_1 = arith.constant 0 : i32
    return %arg0, %c0_i32, %c0_i32_0 : i32, i32, i32
  }
}

</mosaic_0001>

<bundles_post_ra>
// kernel: dice_loss.1
= control target key start
LH: loop header
LB: loop body
LE: loop exit
PB: predicated region body
PF: predicated region fallthrough
CT: control target
= control target key end

     0   :  { %v207_v0 = vmov 0.0   ;;  %vm101_vm0 = vcmask 1041409   ;;  %s258_s2 = inlined_call_operand.vmem [shape: f32[1,2,128], index: 2, kind: output, shape index: {0}]   ;;  %s259_s3 = inlined_call_operand.vmem [shape: f32[1,2,128], index: 3, kind: output, shape index: {1}]   ;;  %s260_s0 = inlined_call_operand.vmem [shape: f32[2,8,128], index: 0, kind: input, shape index: {}]   ;;  %s261_s1 = inlined_call_operand.vmem [shape: f32[2,8,128], index: 1, kind: input, shape index: {}]  }
   0x1   :  { %71 = vst [vmem:[%s258_s2] sm:$0x3] %v207_v0  ;;  %72 = vst [vmem:[%s259_s3] sm:$0x3] %v207_v0  ;;  %v80_v1 = vld [vmem:[%s260_s0] sm:$0xff]  ;;  %v81_v2 = vld [vmem:[%s260_s0 + $0x8] sm:$0xff] }
   0x2   :  { %v82_v3 = vld [vmem:[%s261_s1] sm:$0xff]  ;;  %v83_v4 = vld [vmem:[%s261_s1 + $0x8] sm:$0xff] }
   0x3   :  { %v85_v5 = vmul.f32 %v82_v3, %v80_v1  ;;  %v107_v6 = vadd.f32 %v82_v3, %v80_v1  ;;  %v86_v7 = vmul.f32 %v83_v4, %v81_v2  ;;  %v108_v8 = vadd.f32 %v83_v4, %v81_v2 }
   0x5   :  { %v87_v9 = vrot.slane %v85_v5, 4  ;;  %v109_v10 = vrot.slane %v107_v6, 4  ;;  %v93_v11 = vrot.slane %v86_v7, 4  ;;  %v115_v12 = vrot.slane %v108_v8, 4 }
   0x7   :  { %v88_v13 = vadd.f32 %v87_v9, %v85_v5  ;;  %v110_v14 = vadd.f32 %v109_v10, %v107_v6  ;;  %v94_v15 = vadd.f32 %v93_v11, %v86_v7  ;;  %v116_v16 = vadd.f32 %v115_v12, %v108_v8 }
   0x8   :  { %v84_v31 = vld [vmem:[%s258_s2] sm:$0x3] }
   0x9   :  { %v89_v17 = vrot.slane %v88_v13, 2  ;;  %v111_v18 = vrot.slane %v110_v14, 2  ;;  %v95_v19 = vrot.slane %v94_v15, 2  ;;  %v117_v20 = vrot.slane %v116_v16, 2  ;;  %v106_v33 = vld [vmem:[%s259_s3] sm:$0x3] }
   0xb   :  { %v90_v21 = vadd.f32 %v89_v17, %v88_v13  ;;  %v112_v22 = vadd.f32 %v111_v18, %v110_v14  ;;  %v96_v23 = vadd.f32 %v95_v19, %v94_v15  ;;  %v118_v24 = vadd.f32 %v117_v20, %v116_v16 }
   0xd   :  { %v91_v25 = vrot.slane %v90_v21, 1  ;;  %v113_v26 = vrot.slane %v112_v22, 1  ;;  %v97_v27 = vrot.slane %v96_v23, 1  ;;  %v119_v28 = vrot.slane %v118_v24, 1 }
   0xf   :  { %v92_v29 = vadd.f32 %v91_v25, %v90_v21  ;;  %v114_v30 = vadd.f32 %v113_v26, %v112_v22  ;;  %v98_v32 = vadd.f32 %v97_v27, %v96_v23  ;;  %v120_v34 = vadd.f32 %v119_v28, %v118_v24 }
  0x11   :  { %v102_v35 = vsel %vm101_vm0, %v98_v32, %v92_v29  ;;  %v123_v36 = vsel %vm101_vm0, %v120_v34, %v114_v30 }
  0x12   :  { %v104_v37 = vadd.f32 %v102_v35, %v84_v31  ;;  %v125_v38 = vadd.f32 %v123_v36, %v106_v33 }
  0x14   :  { %105 = vst [vmem:[%s258_s2] sm:$0x3] %v104_v37  ;;  %126 = vst [vmem:[%s259_s3] sm:$0x3] %v125_v38 }

</bundles_post_ra>
